<compile_context>
chip_gen: v5e
topology: v5e:2x2
jax: 0.10.0
libtpu: 0.0.40
codegen_flags: <defaults>
</compile_context>

<pallas_src>
import math
import functools

import jax
import jax.numpy as jnp
from jax.experimental import pallas as pl
from jax.experimental.pallas import tpu as pltpu


def _mhp_kernel(x_ref, wks_ref, hs_ref, wv_ref, wo_ref, consts_ref, o_ref,
                *, nhead: int):
    """One grid step == TB batch rows.

    x_ref      : (TB, S, D)   input block (compute dtype, e.g. bf16)
    wks_ref    : (D, H)       fused (K-projection x scaled-query) score matrix
    hs_ref     : (D, H) f32   0/1 head selector (channel c belongs to head j)
    wv_ref     : (D, D)       V projection weight (pre-transposed)
    wo_ref     : (D, D)       output projection weight (pre-transposed)
    consts_ref : (4, D) f32   rows: [bv, bo + query (residual), gamma, beta]
    o_ref      : (TB, D)      lane-dense output block
    """
    f32 = jnp.float32
    tb, s, d = x_ref.shape
    h = nhead

    consts = consts_ref[...]
    bv, boq, gamma, beta = (consts[0:1, :], consts[1:2, :],
                            consts[2:3, :], consts[3:4, :])

    x2 = x_ref[...].reshape(tb * s, d)                                    # (TB*S, D)

    # V projection: bf16 MXU matmul, f32 accumulation.
    v = jnp.dot(x2, wv_ref[...], preferred_element_type=f32) + bv         # (TB*S, D)

    # Per-head attention scores.  K projection, learned-query dot and the
    # 1/sqrt(dh) scale are pre-fused into wks; the per-head score bias is
    # constant along the key axis, so it cancels in the softmax (dropped).
    scores = jnp.dot(x2, wks_ref[...], preferred_element_type=f32)        # (TB*S, H)
    scores = scores.reshape(tb, s, h)

    # Unnormalized softmax over the key axis S (normalization deferred).
    m = jnp.max(scores, axis=1, keepdims=True)                            # (TB, 1, H)
    p = jnp.exp(scores - m)                                               # (TB, S, H)
    denom = jnp.sum(p, axis=1)                                            # (TB, H)
    # TODO(synk): attention dropout (p=0.3) omitted -- eval-mode semantics.

    # Broadcast the per-head weights back to D lanes by contracting H with the
    # 0/1 selector (exact), weight V and reduce over the key axis.
    # TODO(synk): if MXU-bound on v6e, replace this with an XLU lane-repeat.
    p_full = jax.lax.dot_general(p.reshape(tb * s, h), hs_ref[...],
                                 (((1,), (1,)), ((), ())),
                                 preferred_element_type=f32)              # (TB*S, D)
    attn_u = jnp.sum((p_full * v).reshape(tb, s, d), axis=1)              # (TB, D)
    denom_d = jax.lax.dot_general(denom, hs_ref[...],
                                  (((1,), (1,)), ((), ())),
                                  preferred_element_type=f32)             # (TB, D)
    attn = attn_u / denom_d            # exact reciprocal on the small tensor

    # Output projection, residual (pre-folded into boq), LayerNorm.
    out = jnp.dot(attn.astype(wo_ref.dtype), wo_ref[...],
                  preferred_element_type=f32) + boq                       # (TB, D)
    mean = jnp.mean(out, axis=-1, keepdims=True)
    var = jnp.mean((out - mean) ** 2, axis=-1, keepdims=True)
    normed = (out - mean) * jax.lax.rsqrt(var + 1e-5)
    o_ref[...] = (normed * gamma + beta).astype(o_ref.dtype)


def _physical_vmem_bytes():
    try:
        info = pltpu.get_tpu_info()
        return int(getattr(info, "vmem_capacity_bytes", 64 << 20))
    except Exception:
        return 64 << 20                 # conservative fallback (v7x-sized)


def _choose_tiling(B, S, D, H, x_itemsize):
    """Batch rows per grid step plus VMEM knobs, budgeted against the *live*
    per-step footprint (x block, f32 v / p_full temporaries, score tensors)
    and single-buffered weights, using the current generation's physical VMEM
    (v7x: 64 MiB, v5e/v6e: 128 MiB)."""
    phys = _physical_vmem_bytes()
    step_budget = int(phys * 0.4)       # headroom for compiler scratch / output

    # Live bytes per batch row inside a step:
    #   x block (double-buffered)     2 * S*D*itemsize
    #   v, p_full f32 temporaries     2 * S*D*4
    #   scores / p (f32, H lanes)     2 * S*H*4
    per_row = S * D * (2 * x_itemsize + 8) + 2 * S * H * 4
    # Single-buffered constants (Wv, Wo, wks, hs, packed biases).
    weights = 2 * D * D * x_itemsize + D * H * (x_itemsize + 4) + 4 * D * 4

    tb_cap = max(1, (step_budget - weights) // per_row)
    tb = min(max(1, 512 // max(S, 1)), tb_cap)       # target ~512 MXU rows/step

    x_buffers = 2
    if tb >= B:
        tb = B                                       # whole batch in one step
    else:
        if B >= 16:                                  # keep grid >= 2: both v7x TCs busy
            tb = min(tb, max(8, ((B // 2) // 8) * 8))
        tb = (tb // 8) * 8                           # (tb, D) output sublane alignment
        if tb == 0:                                  # VMEM cap wanted tb < 8:
            tb = min(8, B)                           #   take the alignment floor but
            x_buffers = 1                            #   stop double-buffering x instead
            # TODO(synk): for extreme S*D, also tile the sequence axis.

    grid_n = pl.cdiv(B, tb)
    if grid_n == 1:
        x_buffers = 1                                # no pipelining on a 1-step grid

    used = weights + per_row * tb + (2 << 20)
    vmem_limit = int(min(phys - (8 << 20), max(2 * used, 32 << 20)))
    return tb, grid_n, x_buffers, vmem_limit


def _spec(shape, index_map, buffers):
    """BlockSpec with an explicit buffer count (falls back gracefully if this
    JAX version does not expose pipeline_mode)."""
    try:
        return pl.BlockSpec(shape, index_map, pipeline_mode=pl.Buffered(buffers))
    except (TypeError, AttributeError):
        return pl.BlockSpec(shape, index_map)


def multi_head_pool(x, params, *, nhead: int, compute_dtype=jnp.bfloat16):
    """x: (B, S, D) -> (B, D) float32 (eval-mode MultiHeadPool forward)."""
    B, S, D = x.shape
    if D % nhead != 0:
        raise ValueError(f"d_model={D} must be divisible by nhead={nhead}")
    dh = D // nhead
    f32 = jnp.float32

    # ---- Hoisted, batch-invariant precomputation (outside the kernel) ----
    q0 = params["query"].astype(f32)                                      # (1, D)
    qs = (q0 @ params["wq"].astype(f32) + params["bq"].astype(f32)) \
        * (1.0 / math.sqrt(dh))                                           # (1, D)
    # 0/1 head selector: hs[c, j] = 1 iff channel c belongs to head j.
    hs = (jnp.arange(D)[:, None] // dh ==
          jnp.arange(nhead)[None, :]).astype(f32)                         # (D, H)
    # Fused score matrix (K projection + query dot + 1/sqrt(dh) scale).
    # The per-head score bias ((bk*qs) summed per head) is constant along the
    # key axis, hence cancels in the softmax and is dropped (exact).
    wks = ((params["wk"].astype(f32) * qs) @ hs).astype(compute_dtype)    # (D, H)
    wv = params["wv"].astype(compute_dtype)                               # (D, D)
    wo = params["wo"].astype(compute_dtype)                               # (D, D)
    # Packed (1, D) constants: rows = [bv, bo + query (residual), gamma, beta].
    consts = jnp.concatenate(
        [params["bv"], params["bo"] + q0, params["gamma"], params["beta"]],
        axis=0).astype(f32)                                               # (4, D)
    x_c = x.astype(compute_dtype)

    itemsize = jnp.dtype(compute_dtype).itemsize
    tb, grid_n, x_buffers, vmem_limit = _choose_tiling(B, S, D, nhead, itemsize)

    kernel = functools.partial(_mhp_kernel, nhead=nhead)
    c2 = lambda b: (0, 0)  # noqa: E731

    cost = pl.CostEstimate(
        flops=int(B * S * (2 * D * D + 4 * D * nhead + 3 * D)
                  + B * (2 * D * D + 2 * D * nhead + 12 * D)),
        transcendentals=int(B * (S * nhead + 1)),
        bytes_accessed=int(B * S * D * itemsize + B * D * 4
                           + 2 * D * D * itemsize + 2 * D * nhead * 4 + 16 * D),
    )

    return pl.pallas_call(
        kernel,
        out_shape=jax.ShapeDtypeStruct((B, D), f32),
        grid=(grid_n,),
        in_specs=[
            _spec((tb, S, D), lambda b: (b, 0, 0), x_buffers),   # x block
            _spec((D, nhead), c2, 1),                            # wks (fused scores)
            _spec((D, nhead), c2, 1),                            # hs  (head selector)
            _spec((D, D), c2, 1),                                # Wv
            _spec((D, D), c2, 1),                                # Wo
            _spec((4, D), c2, 1),                                # packed biases/affine
        ],
        out_specs=pl.BlockSpec((tb, D), lambda b: (b, 0)),
        compiler_params=pltpu.CompilerParams(
            dimension_semantics=("parallel",),
            vmem_limit_bytes=vmem_limit),
        cost_estimate=cost,
    )(x_c, wks, hs, wv, wo, consts)


def make_params(key, d_model):
    """Deterministic synthetic init (shapes follow nn.MultiheadAttention + LayerNorm)."""
    ks = jax.random.split(key, 8)
    s = 0.05
    return {
        "query": jax.random.normal(ks[0], (1, d_model), jnp.float32),
        "wq": s * jax.random.normal(ks[1], (d_model, d_model), jnp.float32),
        "wk": s * jax.random.normal(ks[2], (d_model, d_model), jnp.float32),
        "wv": s * jax.random.normal(ks[3], (d_model, d_model), jnp.float32),
        "bq": s * jax.random.normal(ks[4], (1, d_model), jnp.float32),
        "bk": s * jax.random.normal(ks[5], (1, d_model), jnp.float32),
        "bv": s * jax.random.normal(ks[6], (1, d_model), jnp.float32),
        "wo": s * jax.random.normal(ks[7], (d_model, d_model), jnp.float32),
        "bo": jnp.zeros((1, d_model), jnp.float32),
        "gamma": jnp.ones((1, d_model), jnp.float32),
        "beta": jnp.zeros((1, d_model), jnp.float32),
    }


def reference_forward(x, p, *, nhead):
    """Pure-JAX f32 reference matching the PyTorch forward (eval mode)."""
    B, S, D = x.shape
    dh = D // nhead
    q0 = jnp.broadcast_to(p["query"][None], (B, 1, D))            # (B,1,D)
    q = q0 @ p["wq"] + p["bq"]                                    # (B,1,D)
    k = x @ p["wk"] + p["bk"]                                     # (B,S,D)
    v = x @ p["wv"] + p["bv"]                                     # (B,S,D)
    qh = q.reshape(B, 1, nhead, dh).transpose(0, 2, 1, 3)         # (B,H,1,dh)
    kh = k.reshape(B, S, nhead, dh).transpose(0, 2, 1, 3)         # (B,H,S,dh)
    vh = v.reshape(B, S, nhead, dh).transpose(0, 2, 1, 3)         # (B,H,S,dh)
    scores = jnp.einsum("bhqd,bhkd->bhqk", qh, kh) / math.sqrt(dh)
    w = jax.nn.softmax(scores, axis=-1)
    o = jnp.einsum("bhqk,bhkd->bhqd", w, vh)                      # (B,H,1,dh)
    o = o.transpose(0, 2, 1, 3).reshape(B, 1, D)
    o = o @ p["wo"] + p["bo"]                                     # (B,1,D)
    res = o[:, 0, :] + q0[:, 0, :]
    mean = jnp.mean(res, axis=-1, keepdims=True)
    var = jnp.mean((res - mean) ** 2, axis=-1, keepdims=True)
    return (res - mean) / jnp.sqrt(var + 1e-5) * p["gamma"] + p["beta"]


if __name__ == "__main__":
    key = jax.random.PRNGKey(0)
    kx, kp, kx2 = jax.random.split(key, 3)

    # Small shapes consistent with the module: batch=2, seq=8, d_model=32, 4 heads.
    B, S, D, H = 2, 8, 32, 4
    x = jax.random.normal(kx, (B, S, D), jnp.float32)
    params = make_params(kp, D)

    out = jax.block_until_ready(multi_head_pool(x, params, nhead=H))
    ref = reference_forward(x, params, nhead=H)
    assert out.shape == (B, D)
    # Tolerance accommodates bf16 storage of x / projection weights (f32 MXU
    # accumulation).  Structural bugs show up as O(0.1-1) errors on the
    # LayerNorm'd (unit-scale) output.
    assert jnp.allclose(out, ref, atol=2e-2, rtol=2e-2), (
        f"max abs err {jnp.max(jnp.abs(out - ref))}")

    # Also exercise the multi-step (grid >= 2, double-buffered x) path.
    B2 = 128
    x2 = jax.random.normal(kx2, (B2, S, D), jnp.float32)
    out2 = jax.block_until_ready(multi_head_pool(x2, params, nhead=H))
    ref2 = reference_forward(x2, params, nhead=H)
    assert out2.shape == (B2, D)
    assert jnp.allclose(out2, ref2, atol=2e-2, rtol=2e-2), (
        f"max abs err {jnp.max(jnp.abs(out2 - ref2))}")

    print("KERNEL_OK")
</pallas_src>

<mosaic_0001>
module attributes {stable_mosaic.version = 11 : i64} {
  func.func @_mhp_kernel(%arg0: i32, %arg1: memref<2x8x32xbf16, #tpu.memory_space<vmem>>, %arg2: memref<32x4xbf16, #tpu.memory_space<vmem>>, %arg3: memref<32x4xf32, #tpu.memory_space<vmem>>, %arg4: memref<32x32xbf16, #tpu.memory_space<vmem>>, %arg5: memref<32x32xbf16, #tpu.memory_space<vmem>>, %arg6: memref<4x32xf32, #tpu.memory_space<vmem>>, %arg7: memref<2x32xf32, #tpu.memory_space<vmem>>) attributes {dimension_semantics = [#tpu.dimension_semantics<parallel>], iteration_bounds = array<i64: 1>, scalar_prefetch = 0 : i64, scratch_operands = 0 : i64, tpu.core_type = #tpu.core_type<tc>, window_params = [{pipeline_mode = #tpu.pipeline_mode<synchronous>, transform_indices = @transform_0, window_bounds = array<i64: 2, 8, 32>}, {pipeline_mode = #tpu.pipeline_mode<synchronous>, transform_indices = @transform_1, window_bounds = array<i64: 32, 4>}, {pipeline_mode = #tpu.pipeline_mode<synchronous>, transform_indices = @transform_2, window_bounds = array<i64: 32, 4>}, {pipeline_mode = #tpu.pipeline_mode<synchronous>, transform_indices = @transform_3, window_bounds = array<i64: 32, 32>}, {pipeline_mode = #tpu.pipeline_mode<synchronous>, transform_indices = @transform_4, window_bounds = array<i64: 32, 32>}, {pipeline_mode = #tpu.pipeline_mode<synchronous>, transform_indices = @transform_5, window_bounds = array<i64: 4, 32>}, {transform_indices = @transform_6, window_bounds = array<i64: 2, 32>}]} {
    %c0 = arith.constant 0 : index
    %c0_0 = arith.constant 0 : index
    %0 = vector.load %arg6[%c0, %c0_0] : memref<4x32xf32, #tpu.memory_space<vmem>>, vector<4x32xf32>
    %1 = vector.extract_strided_slice %0 {offsets = [0, 0], sizes = [1, 32], strides = [1, 1]} : vector<4x32xf32> to vector<1x32xf32>
    %2 = vector.extract_strided_slice %0 {offsets = [1, 0], sizes = [1, 32], strides = [1, 1]} : vector<4x32xf32> to vector<1x32xf32>
    %3 = vector.extract_strided_slice %0 {offsets = [2, 0], sizes = [1, 32], strides = [1, 1]} : vector<4x32xf32> to vector<1x32xf32>
    %4 = vector.extract_strided_slice %0 {offsets = [3, 0], sizes = [1, 32], strides = [1, 1]} : vector<4x32xf32> to vector<1x32xf32>
    %c0_1 = arith.constant 0 : index
    %c0_2 = arith.constant 0 : index
    %c0_3 = arith.constant 0 : index
    %5 = vector.load %arg1[%c0_1, %c0_2, %c0_3] : memref<2x8x32xbf16, #tpu.memory_space<vmem>>, vector<2x8x32xbf16>
    %6 = vector.shape_cast %5 : vector<2x8x32xbf16> to vector<16x32xbf16>
    %c0_4 = arith.constant 0 : index
    %c0_5 = arith.constant 0 : index
    %7 = vector.load %arg4[%c0_4, %c0_5] : memref<32x32xbf16, #tpu.memory_space<vmem>>, vector<32x32xbf16>
    %cst = arith.constant dense<0.000000e+00> : vector<16x32xf32>
    %8 = tpu.matmul %6, %7, %cst {dimension_numbers = #tpu.dot_dimension_numbers<[1], [0], [0], [1], [0, 0, 1, 1], [], []>} : vector<16x32xbf16>, vector<32x32xbf16>, vector<16x32xf32> -> vector<16x32xf32>
    %9 = vector.broadcast %1 : vector<1x32xf32> to vector<16x32xf32>
    %10 = arith.addf %8, %9 : vector<16x32xf32>
    %c0_6 = arith.constant 0 : index
    %c0_7 = arith.constant 0 : index
    %11 = vector.load %arg2[%c0_6, %c0_7] : memref<32x4xbf16, #tpu.memory_space<vmem>>, vector<32x4xbf16>
    %cst_8 = arith.constant dense<0.000000e+00> : vector<16x4xf32>
    %12 = tpu.matmul %6, %11, %cst_8 {dimension_numbers = #tpu.dot_dimension_numbers<[1], [0], [0], [1], [0, 0, 1, 1], [], []>} : vector<16x32xbf16>, vector<32x4xbf16>, vector<16x4xf32> -> vector<16x4xf32>
    %13 = vector.shape_cast %12 : vector<16x4xf32> to vector<2x8x4xf32>
    %cst_9 = arith.constant dense<0xFF800000> : vector<2x4xf32>
    %14 = vector.multi_reduction <maximumf>, %13, %cst_9 [1] : vector<2x8x4xf32> to vector<2x4xf32>
    %15 = vector.shape_cast %14 : vector<2x4xf32> to vector<2x1x4xf32>
    %16 = vector.broadcast %15 : vector<2x1x4xf32> to vector<2x8x4xf32>
    %17 = arith.subf %13, %16 : vector<2x8x4xf32>
    %18 = math.exp %17 : vector<2x8x4xf32>
    %cst_10 = arith.constant dense<0.000000e+00> : vector<2x4xf32>
    %19 = vector.multi_reduction <add>, %18, %cst_10 [1] : vector<2x8x4xf32> to vector<2x4xf32>
    %20 = vector.shape_cast %18 : vector<2x8x4xf32> to vector<16x4xf32>
    %c0_11 = arith.constant 0 : index
    %c0_12 = arith.constant 0 : index
    %21 = vector.load %arg3[%c0_11, %c0_12] : memref<32x4xf32, #tpu.memory_space<vmem>>, vector<32x4xf32>
    %cst_13 = arith.constant dense<0.000000e+00> : vector<16x32xf32>
    %22 = tpu.matmul %20, %21, %cst_13 {dimension_numbers = #tpu.dot_dimension_numbers<[1], [1], [0], [0], [0, 0, 1, 0], [], []>} : vector<16x4xf32>, vector<32x4xf32>, vector<16x32xf32> -> vector<16x32xf32>
    %23 = arith.mulf %22, %10 : vector<16x32xf32>
    %24 = vector.shape_cast %23 : vector<16x32xf32> to vector<2x8x32xf32>
    %cst_14 = arith.constant dense<0.000000e+00> : vector<2x32xf32>
    %25 = vector.multi_reduction <add>, %24, %cst_14 [1] : vector<2x8x32xf32> to vector<2x32xf32>
    %c0_15 = arith.constant 0 : index
    %c0_16 = arith.constant 0 : index
    %26 = vector.load %arg3[%c0_15, %c0_16] : memref<32x4xf32, #tpu.memory_space<vmem>>, vector<32x4xf32>
    %cst_17 = arith.constant dense<0.000000e+00> : vector<2x32xf32>
    %27 = tpu.matmul %19, %26, %cst_17 {dimension_numbers = #tpu.dot_dimension_numbers<[1], [1], [0], [0], [0, 0, 1, 0], [], []>} : vector<2x4xf32>, vector<32x4xf32>, vector<2x32xf32> -> vector<2x32xf32>
    %28 = arith.divf %25, %27 : vector<2x32xf32>
    %29 = arith.truncf %28 : vector<2x32xf32> to vector<2x32xbf16>
    %c0_18 = arith.constant 0 : index
    %c0_19 = arith.constant 0 : index
    %30 = vector.load %arg5[%c0_18, %c0_19] : memref<32x32xbf16, #tpu.memory_space<vmem>>, vector<32x32xbf16>
    %cst_20 = arith.constant dense<0.000000e+00> : vector<2x32xf32>
    %31 = tpu.matmul %29, %30, %cst_20 {dimension_numbers = #tpu.dot_dimension_numbers<[1], [0], [0], [1], [0, 0, 1, 1], [], []>} : vector<2x32xbf16>, vector<32x32xbf16>, vector<2x32xf32> -> vector<2x32xf32>
    %32 = vector.broadcast %2 : vector<1x32xf32> to vector<2x32xf32>
    %33 = arith.addf %31, %32 : vector<2x32xf32>
    %cst_21 = arith.constant dense<0.000000e+00> : vector<2xf32>
    %34 = vector.multi_reduction <add>, %33, %cst_21 [1] : vector<2x32xf32> to vector<2xf32>
    %35 = vector.shape_cast %34 : vector<2xf32> to vector<2x1xf32>
    %cst_22 = arith.constant 3.200000e+01 : f32
    %36 = vector.broadcast %cst_22 : f32 to vector<2x1xf32>
    %37 = arith.divf %35, %36 : vector<2x1xf32>
    %38 = vector.broadcast %37 : vector<2x1xf32> to vector<2x32xf32>
    %39 = arith.subf %33, %38 : vector<2x32xf32>
    %40 = arith.mulf %39, %39 : vector<2x32xf32>
    %cst_23 = arith.constant dense<0.000000e+00> : vector<2xf32>
    %41 = vector.multi_reduction <add>, %40, %cst_23 [1] : vector<2x32xf32> to vector<2xf32>
    %42 = vector.shape_cast %41 : vector<2xf32> to vector<2x1xf32>
    %cst_24 = arith.constant 3.200000e+01 : f32
    %43 = vector.broadcast %cst_24 : f32 to vector<2x1xf32>
    %44 = arith.divf %42, %43 : vector<2x1xf32>
    %45 = vector.broadcast %37 : vector<2x1xf32> to vector<2x32xf32>
    %46 = arith.subf %33, %45 : vector<2x32xf32>
    %cst_25 = arith.constant 9.99999974E-6 : f32
    %47 = vector.broadcast %cst_25 : f32 to vector<2x1xf32>
    %48 = arith.addf %44, %47 : vector<2x1xf32>
    %49 = math.rsqrt %48 : vector<2x1xf32>
    %50 = vector.broadcast %49 : vector<2x1xf32> to vector<2x32xf32>
    %51 = arith.mulf %46, %50 : vector<2x32xf32>
    %52 = vector.broadcast %3 : vector<1x32xf32> to vector<2x32xf32>
    %53 = arith.mulf %51, %52 : vector<2x32xf32>
    %54 = vector.broadcast %4 : vector<1x32xf32> to vector<2x32xf32>
    %55 = arith.addf %53, %54 : vector<2x32xf32>
    %c0_26 = arith.constant 0 : index
    %c0_27 = arith.constant 0 : index
    %56 = vector.load %arg7[%c0_26, %c0_27] : memref<2x32xf32, #tpu.memory_space<vmem>>, vector<2x32xf32>
    tpu.vector_store %arg7[%c0_26, %c0_27], %55 {strides = array<i32>} : memref<2x32xf32, #tpu.memory_space<vmem>>, vector<2x32xf32>,
    return
  }
  func.func @transform_0(%arg0: i32) -> (i32, i32, i32) {
    %c0_i32 = arith.constant 0 : i32
    %c0_i32_0 = arith.constant 0 : i32
    %c0_i32_1 = arith.constant 0 : i32
    return %arg0, %c0_i32, %c0_i32_0 : i32, i32, i32
  }
  func.func @transform_1(%arg0: i32) -> (i32, i32) {
    %c0_i32 = arith.constant 0 : i32
    %c0_i32_0 = arith.constant 0 : i32
    %c0_i32_1 = arith.constant 0 : i32
    return %c0_i32, %c0_i32_0 : i32, i32
  }
  func.func @transform_2(%arg0: i32) -> (i32, i32) {
    %c0_i32 = arith.constant 0 : i32
    %c0_i32_0 = arith.constant 0 : i32
    %c0_i32_1 = arith.constant 0 : i32
    return %c0_i32, %c0_i32_0 : i32, i32
  }
  func.func @transform_3(%arg0: i32) -> (i32, i32) {
    %c0_i32 = arith.constant 0 : i32
    %c0_i32_0 = arith.constant 0 : i32
    %c0_i32_1 = arith.constant 0 : i32
    return %c0_i32, %c0_i32_0 : i32, i32
  }
  func.func @transform_4(%arg0: i32) -> (i32, i32) {
    %c0_i32 = arith.constant 0 : i32
    %c0_i32_0 = arith.constant 0 : i32
    %c0_i32_1 = arith.constant 0 : i32
    return %c0_i32, %c0_i32_0 : i32, i32
  }
  func.func @transform_5(%arg0: i32) -> (i32, i32) {
    %c0_i32 = arith.constant 0 : i32
    %c0_i32_0 = arith.constant 0 : i32
    %c0_i32_1 = arith.constant 0 : i32
    return %c0_i32, %c0_i32_0 : i32, i32
  }
  func.func @transform_6(%arg0: i32) -> (i32, i32) {
    %c0_i32 = arith.constant 0 : i32
    %c0_i32_0 = arith.constant 0 : i32
    return %arg0, %c0_i32 : i32, i32
  }
}

</mosaic_0001>

<bundles_post_ra>
// kernel: tpu_custom_call.1
= control target key start
LH: loop header
LB: loop body
LE: loop exit
PB: predicated region body
PF: predicated region fallthrough
CT: control target
= control target key end

     0   :  { %s543_s0 = inlined_call_operand.vmem [shape: bf16[2,8,32], index: 0, kind: input, shape index: {}]   ;;  %s544_s1 = inlined_call_operand.vmem [shape: bf16[32,4], index: 1, kind: input, shape index: {}]   ;;  %s545_s2 = inlined_call_operand.vmem [shape: f32[32,4], index: 2, kind: input, shape index: {}]   ;;  %s546_s3 = inlined_call_operand.vmem [shape: bf16[32,32], index: 3, kind: input, shape index: {}]   ;;  %s547_s4 = inlined_call_operand.vmem [shape: bf16[32,32], index: 4, kind: input, shape index: {}]   ;;  %s548_s5 = inlined_call_operand.vmem [shape: f32[4,32], index: 5, kind: input, shape index: {}]   ;;  %s549_s6 = inlined_call_operand.hbm [shape: f32[2,32], index: 6, kind: output, shape index: {}]  }
   0x1   :  { %v393_v0 = vld [vmem:[%s544_s1 + $0x8] sm:$0xff] }
   0x2   :  { %11 = vsyncpa [#allocation3], 0  ;;  %90 = vmatpush.bf16.msra.mxu1 %v393_v0  ;;  %v392_v1 = vld [vmem:[%s544_s1] sm:$0xff]  ;;  %vm50_vm0 = vcmask 261120   ;;  %vm98_vm1 = vcmask 31744   ;;  %v136_v3 = vld [vmem:[%s545_s2 + $0x18] sm:$0xff] }
   0x3   :  { %v389_v2 = vld [vmem:[%s543_s0] sm:$0xff]  ;;  %369 = vmatpush.xpose.msk.msra.mxu2 %vm98_vm1, %v136_v3  ;;  %375 = vmatpush.xpose.msk.msra.mxu3 %vm98_vm1, %v136_v3  ;;  %v135_v4 = vld [vmem:[%s545_s2 + $0x10] sm:$0xff]  ;;  %v134_v5 = vld [vmem:[%s545_s2 + $0x8] sm:$0xff]  ;;  %vm196_vm2 = vcmask 1041409   ;;  %vm296_vm11 = vcmask 254976   ;;  %s338_s19 = sshll.u32 %s549_s6, 4  ;;  %s339_s19 = int_to_ptr.hbm [resolvable:$true] %s338_s19 }
   0x4   :  { %v391_v6 = vld [vmem:[%s546_s3 + $0x8] sm:$0xff]  ;;  %v133_v7 = vld [vmem:[%s545_s2] sm:$0xff] }
   0x5   :  { %60 = vmatpush.bf16.msra.mxu0 %v391_v6  ;;  %v390_v8 = vld [vmem:[%s546_s3] sm:$0xff]  ;;  %v395_v53 = vld [vmem:[%s547_s4 + $0x8] sm:$0xff] }
   0x6   :  { %91 = vmatpush.bf16.msra.mxu1 %v392_v1  ;;  %v521_v47 = vld [vmem:[%s548_s5] sm:$0xf] }
   0x7   :  { %370 = vmatpush.xpose.msk.msra.mxu2 %vm98_vm1, %v135_v4  ;;  %376 = vmatpush.xpose.msk.msra.mxu3 %vm98_vm1, %v135_v4  ;;  %v32_v49 = vperm.slane %v521_v47, 0  ;;  %v394_v56 = vld [vmem:[%s547_s4] sm:$0xff]  ;;  %s437_s4 = smov [#allocation2]  }
   0x8   :  { %s336_s5 = sshll.u32 %s437_s4, 4  ;;  %s337_s5 = int_to_ptr.vmem [resolvable:$true] %s336_s5 }
   0x9   :  { %368 = vmatmul.msk.bf16.vlgmr.msra.gmra.mxu1 %vm50_vm0, %v389_v2  ;;  %61 = vmatpush.bf16.msra.mxu0 %v390_v8 }
   0xb   :  { %371 = vmatpush.xpose.msk.msra.mxu2 %vm98_vm1, %v134_v5  ;;  %377 = vmatpush.xpose.msk.msra.mxu3 %vm98_vm1, %v134_v5 }
   0xc   :  { %359 = vmatmul.msk.bf16.vlgmr.msra.gmra.mxu0 %vm50_vm0, %v389_v2 }
   0xd   :  { %289 = vmatpush.bf16.msrb.mxu0 %v395_v53 }
   0xf   :  { %372 = vmatpush.xpose.msk.msra.mxu2 %vm98_vm1, %v133_v7  ;;  %378 = vmatpush.xpose.msk.msra.mxu3 %vm98_vm1, %v133_v7 }
  0x11   :  { %290 = vmatpush.bf16.msrb.mxu0 %v394_v56 }
  0x86   :  { %v93_v9 = vpop.f32.mrf.mxu1 }
  0x87   :  { %v99_v10 = vsel %vm98_vm1, %v93_v9, -inf }
  0x88   :  { %v100_v11 = vrot.slane %v99_v10, 4 }
  0x89   :  { %v63_v46 = vpop.f32.mrf.mxu0 }
  0x8a   :  { %v101_v12 = vmax.f32 %v99_v10, %v100_v11  ;;  %v64_v51 = vadd.f32 %v63_v46, %v32_v49 }
  0x8c   :  { %v102_v13 = vrot.slane %v101_v12, 2 }
  0x8e   :  { %v103_v14 = vmax.f32 %v101_v12, %v102_v13  ;;  %v95_v15 = vpop.f32.mrf.mxu1 }
  0x8f   :  { %v106_v16 = vsel %vm98_vm1, %v95_v15, -inf }
  0x90   :  { %v104_v17 = vrot.slane %v103_v14, 1  ;;  %v107_v18 = vrot.slane %v106_v16, 4 }
  0x91   :  { %v65_v50 = vpop.f32.mrf.mxu0 }
  0x92   :  { %v105_v19 = vmax.f32 %v103_v14, %v104_v17  ;;  %v108_v20 = vmax.f32 %v106_v16, %v107_v18  ;;  %v66_v52 = vadd.f32 %v65_v50, %v32_v49 }
  0x94   :  { %v113_v21 = vsub.f32 %v93_v9, %v105_v19  ;;  %v109_v22 = vrot.slane %v108_v20, 2 }
  0x96   :  { %v115_v23 = vmul.f32 1.442695, %v113_v21  ;;  %v110_v24 = vmax.f32 %v108_v20, %v109_v22 }
  0x98   :  { %398 = vpow2.f32 %v115_v23  ;;  %v111_v25 = vrot.slane %v110_v24, 1 }
  0x9a   :  { %v112_v26 = vmax.f32 %v110_v24, %v111_v25 }
  0x9c   :  { %v114_v27 = vsub.f32 %v95_v15, %v112_v26 }
  0x9e   :  { %v399_v28 = vpop.eup %398  ;;  %v117_v29 = vmul.f32 1.442695, %v114_v27 }
  0x9f   :  { %v119_v30 = vsel %vm98_vm1, %v399_v28, 0.0  ;;  %373 = vmatmul.msk.f32.vlgmr.msra.gmra.mxu2 %vm98_vm1, %v399_v28 }
  0xa0   :  { %v120_v31 = vrot.slane %v119_v30, 4  ;;  %400 = vpow2.f32 %v117_v29 }
  0xa2   :  { %v121_v32 = vadd.f32 %v120_v31, %v119_v30 }
  0xa4   :  { %v122_v34 = vrot.slane %v121_v32, 2 }
  0xa6   :  { %v401_v33 = vpop.eup %400  ;;  %v123_v38 = vadd.f32 %v122_v34, %v121_v32 }
  0xa7   :  { %v126_v35 = vsel %vm98_vm1, %v401_v33, 0.0  ;;  %374 = vmatmul.msk.f32.gmra.mxu2 %vm98_vm1, %v401_v33 }
  0xa8   :  { %v127_v36 = vrot.slane %v126_v35, 4  ;;  %v124_v40 = vrot.slane %v123_v38, 1 }
  0xaa   :  { %v128_v37 = vadd.f32 %v127_v36, %v126_v35  ;;  %v125_v43 = vadd.f32 %v124_v40, %v123_v38 }
  0xac   :  { %v129_v39 = vrot.slane %v128_v37, 2 }
  0xae   :  { %v130_v41 = vadd.f32 %v129_v39, %v128_v37  ;;  %v260_v39 = vperm.slane %v521_v47, 1 }
  0xb0   :  { %v131_v42 = vrot.slane %v130_v41, 1 }
  0xb2   :  { %v132_v44 = vadd.f32 %v131_v42, %v130_v41 }
  0xb4   :  { %v197_v45 = vsel %vm196_vm2, %v132_v44, %v125_v43  ;;  %v436_v44 = vmov 32.0  }
  0xb5   :  { %379 = vmatmul.msk.f32.vlgmr.msra.gmra.mxu3 %vm98_vm1, %v197_v45 }
 0x122   :  { %v172_v48 = vpop.f32.mrf.mxu2 }
 0x123   :  { %v178_v55 = vmul.f32 %v172_v48, %v64_v51 }
 0x125   :  { %v180_v58 = vsel %vm50_vm0, %v178_v55, 0.0 }
 0x126   :  { %v181_v60 = vrot.slane %v180_v58, 4 }
 0x128   :  { %v182_v62 = vadd.f32 %v181_v60, %v180_v58 }
 0x12a   :  { %v175_v54 = vpop.f32.mrf.mxu2  ;;  %v183_v2 = vrot.slane %v182_v62, 2 }
 0x12b   :  { %v179_v57 = vmul.f32 %v175_v54, %v66_v52 }
 0x12c   :  { %v184_v5 = vadd.f32 %v183_v2, %v182_v62  ;;  %v326_v2 = vperm.slane %v521_v47, 2 }
 0x12d   :  { %v187_v59 = vsel %vm50_vm0, %v179_v57, 0.0 }
 0x12e   :  { %v188_v61 = vrot.slane %v187_v59, 4  ;;  %v185_v11 = vrot.slane %v184_v5, 1 }
 0x130   :  { %v189_v0 = vadd.f32 %v188_v61, %v187_v59  ;;  %v186_v21 = vadd.f32 %v185_v11, %v184_v5  ;;  %v328_v5 = vperm.slane %v521_v47, 3 }
 0x132   :  { %v190_v3 = vrot.slane %v189_v0, 2 }
 0x134   :  { %v191_v8 = vadd.f32 %v190_v3, %v189_v0 }
 0x136   :  { %v192_v16 = vrot.slane %v191_v8, 1 }
 0x138   :  { %v217_v63 = vpop.f32.mrf.mxu3  ;;  %v193_v27 = vadd.f32 %v192_v16, %v191_v8 }
 0x139   :  { %v221_v1 = vrot.slane %v217_v63, 1  ;;  %402 = vrcp.f32 %v217_v63  ;;  %v235_v12 = vand.u32 2147483648, %v217_v63  ;;  %v233_v14 = vand.u32 2147483647, %v217_v63 }
 0x13a   :  { %vm229_vm4 = vweird.f32 %v217_v63 }
 0x13b   :  { %404 = vrcp.f32 %v221_v1  ;;  %v250_v17 = vand.u32 2147483648, %v221_v1  ;;  %v248_v20 = vand.u32 2147483647, %v221_v1  ;;  %v236_v22 = vor.u32 1.1754944e-38, %v235_v12 }
 0x13c   :  { %vm234_vm7 = vcmp.eq.f32.partialorder %v233_v14, 8.507059e+37  ;;  %vm244_vm8 = vweird.f32 %v221_v1  ;;  %406 = vrcp.f32 %v436_v44 }
 0x13d   :  { %v251_v26 = vor.u32 1.1754944e-38, %v250_v17  ;;  %vm249_vm10 = vcmp.eq.f32.partialorder %v248_v20, 8.507059e+37 }
 0x13f   :  { %v403_v4 = vpop.eup %402 }
 0x140   :  { %v225_v6 = vmul.f32 %v403_v4, %v217_v63  ;;  %vm230_vm3 = vweird.f32 %v403_v4 }
 0x141   :  { %v405_v7 = vpop.eup %404  ;;  %vm231_vm6 = vmor %vm229_vm4, %vm230_vm3 }
 0x142   :  { %v226_v9 = vsub.f32 1.0, %v225_v6  ;;  %v240_v10 = vmul.f32 %v405_v7, %v221_v1  ;;  %vm245_vm5 = vweird.f32 %v405_v7  ;;  %v407_v45 = vpop.eup %406 }
 0x143   :  { %vm246_vm9 = vmor %vm244_vm8, %vm245_vm5  ;;  %v301_v46 = vmul.f32 32.0, %v407_v45  ;;  %vm305_vm12 = vweird.f32 %v407_v45 }
 0x144   :  { %v227_v13 = vmul.f32 %v403_v4, %v226_v9  ;;  %v241_v15 = vsub.f32 1.0, %v240_v10 }
 0x145   :  { %v302_v48 = vsub.f32 1.0, %v301_v46 }
 0x146   :  { %v228_v18 = vadd.f32 %v403_v4, %v227_v13  ;;  %v242_v19 = vmul.f32 %v405_v7, %v241_v15 }
 0x147   :  { %v303_v49 = vmul.f32 %v407_v45, %v302_v48 }
 0x148   :  { %v232_v23 = vsel %vm231_vm6, %v403_v4, %v228_v18  ;;  %v243_v24 = vadd.f32 %v405_v7, %v242_v19 }
 0x149   :  { %v237_v25 = vsel %vm234_vm7, %v236_v22, %v232_v23  ;;  %v304_v50 = vadd.f32 %v407_v45, %v303_v49 }
 0x14a   :  { %v238_v28 = vmul.f32 %v237_v25, %v186_v21  ;;  %v247_v29 = vsel %vm246_vm9, %v405_v7, %v243_v24 }
 0x14b   :  { %v252_v30 = vsel %vm249_vm10, %v251_v26, %v247_v29  ;;  %v306_v51 = vsel %vm305_vm12, %v407_v45, %v304_v50 }
 0x14c   :  { %v253_v31 = vmul.f32 %v252_v30, %v193_v27  ;;  %v254_v32 = vpack.c.bf16 %v238_v28, %v238_v28 }
 0x14e   :  { %v255_v33 = vpack.c.bf16 %v253_v31, %v253_v31  ;;  %v263_v35 = vunpack.c.l.b16 %v254_v32 }
 0x150   :  { %v264_v34 = vunpack.c.l.b16 %v255_v33 }
 0x152   :  { %v265_v36 = vrot.slane %v264_v34, 7 }
 0x154   :  { %v266_v37 = vsel %vm196_vm2, %v265_v36, %v263_v35 }
 0x155   :  { %v267_v38 = vpack.c.b16 %v266_v37, %v266_v37 }
 0x157   :  { %388 = vmatmul.msk.bf16.vlgmr.msrb.gmra.mxu0 %vm50_vm0, %v267_v38 }
 0x1d4   :  { %v292_v40 = vpop.f32.mrf.mxu0 }
 0x1d5   :  { %v293_v41 = vadd.f32 %v292_v40, %v260_v39 }
 0x1d7   :  { %v297_v42 = vsel %vm296_vm11, %v293_v41, 0.0 }
 0x1d8   :  { %298 = vadd.xlane.f32.xlu0 %v297_v42 }
 0x1dc   :  { %v294_v43 = vpop.f32.mrf.mxu0 }
 0x24b   :  { %v299_v52 = vpop.xlane.xlu0 %298 }
 0x24c   :  { %v307_v53 = vmul.f32 %v306_v51, %v299_v52 }
 0x24e   :  { %v308_v54 = vsub.f32 %v293_v41, %v307_v53 }
 0x250   :  { %v309_v55 = vmul.f32 %v308_v54, %v308_v54 }
 0x252   :  { %v310_v56 = vsel %vm296_vm11, %v309_v55, 0.0 }
 0x253   :  { %311 = vadd.xlane.f32.xlu0 %v310_v56 }
 0x2c6   :  { %v312_v57 = vpop.xlane.xlu0 %311 }
 0x2c7   :  { %v313_v58 = vmul.f32 %v312_v57, %v306_v51 }
 0x2c9   :  { %v314_v59 = vadd.f32 1e-05, %v313_v58 }
 0x2cb   :  { %408 = vrsqrt.f32 %v314_v59  ;;  %vm321_vm14 = vweird.f32 %v314_v59 }
 0x2d1   :  { %v409_v60 = vpop.eup %408 }
 0x2d2   :  { %v316_v61 = vmul.f32 %v409_v60, %v314_v59  ;;  %vm322_vm13 = vweird.f32 %v409_v60 }
 0x2d3   :  { %vm323_vm15 = vmor %vm321_vm14, %vm322_vm13 }
 0x2d4   :  { %v317_v62 = vmul.f32 %v409_v60, %v316_v61 }
 0x2d6   :  { %v318_v63 = vmul.f32 0.5, %v317_v62 }
 0x2d8   :  { %v319_v0 = vsub.f32 1.5, %v318_v63 }
 0x2da   :  { %v320_v1 = vmul.f32 %v409_v60, %v319_v0 }
 0x2dc   :  { %v324_v3 = vsel %vm323_vm15, %v409_v60, %v320_v1 }
 0x2dd   :  { %v325_v4 = vmul.f32 %v324_v3, %v308_v54 }
 0x2df   :  { %v327_v6 = vmul.f32 %v326_v2, %v325_v4 }
 0x2e1   :  { %v329_v7 = vadd.f32 %v328_v5, %v327_v6 }
 0x2e3   :  { %330 = vst.msk [vmem:[#allocation2] sm:$0x3] %vm296_vm11, %v329_v7 }
 0x2e4   :  { %341 = dma.vmem_to_hbm [thread:$0]  %s337_s5, 32, %s339_s19, [#allocation3]  }
 0x2e5   :  { %434 = dma.done.wait [#allocation3], 32  }
 0x2e6   :  { %435 = vsyncadd [#allocation3], 4294967264 }
 0x2e7   :  { %346 = vsyncpa [#allocation3], 1 }

</bundles_post_ra>
